<compile_context>
chip_gen: v7x
topology: tpu7x:2x2x1
jax: 0.10.0
libtpu: 0.0.40
codegen_flags: <defaults>
</compile_context>

<pallas_src>
import functools
import math

import jax
import jax.numpy as jnp
from jax.experimental import pallas as pl
from jax.experimental.pallas import tpu as pltpu

LN_EPS = 1e-6
_INV_SQRT2 = 1.0 / math.sqrt(2.0)


# ---------------------------------------------------------------------------
# Small helpers
# ---------------------------------------------------------------------------

def _round_up(n, m):
    return ((n + m - 1) // m) * m


def _row_tile(M, tile_m):
    return max(8, min(_round_up(tile_m, 8), _round_up(M, 8)))


@functools.lru_cache(maxsize=None)
def _vmem_cap_bytes():
    """Per-generation VMEM budget: ~85% of physical (v5e/v6e ~109 MiB, v7x ~54 MiB)."""
    try:
        cap = int(pltpu.get_tpu_info().vmem_capacity_bytes)
    except Exception:
        cap = 64 << 20
    return max(32 << 20, int(cap * 0.85))


def _vmem_limit_bytes(resident_bytes, cap):
    # 2x estimated residency + headroom, floored at 32 MiB, capped per generation.
    return int(min(max(2 * resident_bytes + (8 << 20), 32 << 20), cap))


@functools.lru_cache(maxsize=None)
def _buffered_supported():
    """Feature-detect pl.Buffered(1) once with a tiny kernel (robust under jit)."""
    if not hasattr(pl, "Buffered"):
        return False
    try:
        def probe(a_ref, w_ref, o_ref):
            o_ref[...] = a_ref[...] + w_ref[...]
        f = pl.pallas_call(
            probe,
            out_shape=jax.ShapeDtypeStruct((8, 128), jnp.float32),
            grid=(1,),
            in_specs=[pl.BlockSpec((8, 128), lambda i: (0, 0)),
                      pl.BlockSpec((8, 128), lambda i: (0, 0),
                                   pipeline_mode=pl.Buffered(1))],
            out_specs=pl.BlockSpec((8, 128), lambda i: (0, 0)))
        jax.block_until_ready(
            f(jnp.zeros((8, 128), jnp.float32), jnp.ones((8, 128), jnp.float32)))
        return True
    except Exception:
        return False


def _const_spec(shape, single_buf):
    # Constant-indexed weight / bias / LN blocks (resident across the grid).
    if single_buf:
        return pl.BlockSpec(shape, lambda *_: (0,) * len(shape),
                            pipeline_mode=pl.Buffered(1))
    return pl.BlockSpec(shape, lambda *_: (0,) * len(shape))


def _layernorm_f32(v, gamma_row, beta_row):
    # torch.nn.LayerNorm semantics: biased variance, eps inside the sqrt.
    mean = jnp.mean(v, axis=-1, keepdims=True)
    var = jnp.mean(jnp.square(v - mean), axis=-1, keepdims=True)
    return (v - mean) * jax.lax.rsqrt(var + LN_EPS) * gamma_row + beta_row


# ---------------------------------------------------------------------------
# Kernels
# ---------------------------------------------------------------------------

def _ln_qkv_kernel(x_ref, g1_ref, b1_ref, wqkv_ref, bqkv_ref, o_ref, *, compute_dtype):
    x = x_ref[...].astype(jnp.float32)                      # (tm, H)
    xn = _layernorm_f32(x, g1_ref[...], b1_ref[...])        # attention_norm
    qkv = jnp.dot(xn.astype(compute_dtype), wqkv_ref[...],  # fused Q|K|V matmul
                  preferred_element_type=jnp.float32)
    o_ref[...] = (qkv + bqkv_ref[...]).astype(o_ref.dtype)  # (tm, 3H)


def _attn_core_kernel(q_ref, k_ref, v_ref, o_ref, *, scale, approx_recip):
    q = q_ref[0, 0]                                         # (tq, hd), compute dtype
    k = k_ref[0, 0]                                         # (S,  hd)
    v = v_ref[0, 0]                                         # (S,  hd)
    # q @ k^T via dot_general contracting the head dim (no materialized transpose).
    s = jax.lax.dot_general(q, k, dimension_numbers=(((1,), (1,)), ((), ())),
                            preferred_element_type=jnp.float32) * scale
    s = s - jnp.max(s, axis=-1, keepdims=True)              # stable softmax (f32)
    p = jnp.exp(s)
    denom = jnp.sum(p, axis=-1, keepdims=True)
    p = p * pl.reciprocal(denom, approx=approx_recip)       # EUP reciprocal
    # TODO(synk): attention dropout omitted (eval-mode identity).
    ctx = jnp.dot(p.astype(v.dtype), v, preferred_element_type=jnp.float32)
    o_ref[0, 0] = ctx.astype(o_ref.dtype)                   # (tq, hd)


def _proj_ffn_kernel(x_ref, ctx_ref, wo_ref, bo_ref, g2_ref, be2_ref,
                     w1_ref, b1_ref, w2_ref, b2_ref, o_ref, *, compute_dtype):
    x = x_ref[...].astype(jnp.float32)                      # (tm, H) original input
    y = jnp.dot(ctx_ref[...], wo_ref[...],                  # attention output proj
                preferred_element_type=jnp.float32) + bo_ref[...] + x
    # TODO(synk): projection dropout omitted (eval-mode identity).
    yn = _layernorm_f32(y, g2_ref[...], be2_ref[...])       # ffn_norm
    h = jnp.dot(yn.astype(compute_dtype), w1_ref[...],
                preferred_element_type=jnp.float32) + b1_ref[...]
    # exact (erf-based) GELU, matching torch.nn.functional.gelu default
    h = 0.5 * h * (1.0 + jax.lax.erf(h * _INV_SQRT2))
    # TODO(synk): MLP dropout omitted (eval-mode identity).
    out = jnp.dot(h.astype(compute_dtype), w2_ref[...],
                  preferred_element_type=jnp.float32) + b2_ref[...]
    o_ref[...] = (out + y).astype(o_ref.dtype)              # residual with pre-norm y


# ---------------------------------------------------------------------------
# pallas_call wrappers
# ---------------------------------------------------------------------------

def _ln_qkv(x2d, g1, b1, wqkv, bqkv, *, tile_m, compute_dtype, single_buf, vmem_cap):
    M, H = x2d.shape
    H3 = wqkv.shape[1]
    tm = _row_tile(M, tile_m)
    c_item = jnp.dtype(compute_dtype).itemsize
    x_item = x2d.dtype.itemsize
    wbuf = 1 if single_buf else 2
    resident = (wbuf * (H * H3 * c_item + (2 * H + H3) * 4)
                + 2 * tm * H * x_item + 2 * tm * H3 * c_item
                + tm * (H + H3) * 4)
    return pl.pallas_call(
        functools.partial(_ln_qkv_kernel, compute_dtype=compute_dtype),
        out_shape=jax.ShapeDtypeStruct((M, H3), compute_dtype),
        grid_spec=pltpu.PrefetchScalarGridSpec(
            num_scalar_prefetch=0,
            grid=(pl.cdiv(M, tm),),
            in_specs=[
                pl.BlockSpec((tm, H), lambda i: (i, 0)),    # x rows (pipelined)
                _const_spec((1, H), single_buf),            # LN1 gamma
                _const_spec((1, H), single_buf),            # LN1 beta
                _const_spec((H, H3), single_buf),           # fused Wqkv
                _const_spec((1, H3), single_buf),           # fused bqkv
            ],
            out_specs=pl.BlockSpec((tm, H3), lambda i: (i, 0)),
        ),
        compiler_params=pltpu.CompilerParams(
            dimension_semantics=("parallel",),
            vmem_limit_bytes=_vmem_limit_bytes(resident, vmem_cap)),
        cost_estimate=pl.CostEstimate(
            flops=int(2 * M * H * H3),
            transcendentals=0,
            bytes_accessed=int(M * H * x_item + M * H3 * c_item
                               + (H * H3 + H3) * c_item + 2 * H * 4)),
    )(x2d, g1, b1, wqkv, bqkv)


def _attn_core(q, k, v, *, tile_q, approx_recip, vmem_cap):
    B, NH, S, HD = q.shape
    tq = max(8, min(_round_up(tile_q, 8), _round_up(S, 8)))
    c_item = q.dtype.itemsize
    resident = (2 * (2 * tq * HD + 2 * S * HD) * c_item
                + 2 * tq * S * 4 + tq * HD * 4)
    return pl.pallas_call(
        functools.partial(_attn_core_kernel,
                          scale=1.0 / math.sqrt(HD), approx_recip=approx_recip),
        out_shape=jax.ShapeDtypeStruct((B, NH, S, HD), q.dtype),
        grid_spec=pltpu.PrefetchScalarGridSpec(
            num_scalar_prefetch=0,
            grid=(B, NH, pl.cdiv(S, tq)),
            in_specs=[
                pl.BlockSpec((1, 1, tq, HD), lambda b, h, qi: (b, h, qi, 0)),  # Q tile
                pl.BlockSpec((1, 1, S, HD), lambda b, h, qi: (b, h, 0, 0)),    # K (full)
                pl.BlockSpec((1, 1, S, HD), lambda b, h, qi: (b, h, 0, 0)),    # V (full)
            ],
            out_specs=pl.BlockSpec((1, 1, tq, HD), lambda b, h, qi: (b, h, qi, 0)),
        ),
        compiler_params=pltpu.CompilerParams(
            dimension_semantics=("parallel", "parallel", "parallel"),
            vmem_limit_bytes=_vmem_limit_bytes(resident, vmem_cap)),
        cost_estimate=pl.CostEstimate(
            flops=int(4 * B * NH * S * S * HD),
            transcendentals=int(B * NH * S * S),
            bytes_accessed=int(4 * B * NH * S * HD * c_item)),
    )(q, k, v)


def _proj_ffn(x2d, ctx2d, p, *, tile_m, compute_dtype, single_buf, vmem_cap):
    M, H = x2d.shape
    D = p["w1"].shape[1]
    tm = _row_tile(M, tile_m)
    cdt = jnp.dtype(compute_dtype)
    c_item = cdt.itemsize
    x_item = x2d.dtype.itemsize
    wbuf = 1 if single_buf else 2
    resident = (wbuf * ((H * H + 2 * H * D) * c_item + (4 * H + D) * 4)
                + 2 * tm * H * (x_item + c_item) + 2 * tm * H * x_item
                + tm * D * 4 + 2 * tm * H * 4)
    wo = p["wo"].astype(cdt)
    w1 = p["w1"].astype(cdt)
    w2 = p["w2"].astype(cdt)
    return pl.pallas_call(
        functools.partial(_proj_ffn_kernel, compute_dtype=cdt),
        out_shape=jax.ShapeDtypeStruct((M, H), x2d.dtype),
        grid_spec=pltpu.PrefetchScalarGridSpec(
            num_scalar_prefetch=0,
            grid=(pl.cdiv(M, tm),),
            in_specs=[
                pl.BlockSpec((tm, H), lambda i: (i, 0)),    # x rows (residual)
                pl.BlockSpec((tm, H), lambda i: (i, 0)),    # attention context rows
                _const_spec((H, H), single_buf),            # Wo
                _const_spec((1, H), single_buf),            # bo
                _const_spec((1, H), single_buf),            # LN2 gamma
                _const_spec((1, H), single_buf),            # LN2 beta
                _const_spec((H, D), single_buf),            # W1
                _const_spec((1, D), single_buf),            # b1
                _const_spec((D, H), single_buf),            # W2
                _const_spec((1, H), single_buf),            # b2
            ],
            out_specs=pl.BlockSpec((tm, H), lambda i: (i, 0)),
        ),
        compiler_params=pltpu.CompilerParams(
            dimension_semantics=("parallel",),
            vmem_limit_bytes=_vmem_limit_bytes(resident, vmem_cap)),
        cost_estimate=pl.CostEstimate(
            flops=int(2 * M * H * H + 4 * M * H * D),
            transcendentals=int(M * D),
            bytes_accessed=int(2 * M * H * x_item + M * H * c_item
                               + (H * H + 2 * H * D) * c_item)),
    )(x2d, ctx2d, wo, p["bo"], p["ln2_g"], p["ln2_b"], w1, p["b1"], w2, p["b2"])


def block_forward(x, params, *, num_heads, compute_dtype=jnp.bfloat16,
                  tile_m=512, tile_q=256):
    """Full TranSalNet `Block` forward (inference semantics)."""
    B, S, H = x.shape
    assert H % num_heads == 0, "hidden_size must be divisible by num_heads"
    hd = H // num_heads
    M = B * S
    cdt = jnp.dtype(compute_dtype)
    single_buf = _buffered_supported()
    vmem_cap = _vmem_cap_bytes()

    x2d = x.reshape(M, H)

    # 1) LN1 + fused QKV projection (row-tiled, pipelined, megacore-parallel).
    wqkv = jnp.concatenate(
        [params["wq"], params["wk"], params["wv"]], axis=1).astype(cdt)
    bqkv = jnp.concatenate(
        [params["bq"], params["bk"], params["bv"]], axis=1).astype(jnp.float32)
    qkv = _ln_qkv(x2d, params["ln1_g"], params["ln1_b"], wqkv, bqkv,
                  tile_m=tile_m, compute_dtype=cdt,
                  single_buf=single_buf, vmem_cap=vmem_cap)

    # Head split in XLA (keeps the kernels free of transposes / concats).
    qkv4 = qkv.reshape(B, S, 3, num_heads, hd)
    q = jnp.transpose(qkv4[:, :, 0], (0, 2, 1, 3))          # (B, NH, S, hd)
    k = jnp.transpose(qkv4[:, :, 1], (0, 2, 1, 3))
    v = jnp.transpose(qkv4[:, :, 2], (0, 2, 1, 3))

    # 2) per-(batch, head, q-tile) softmax attention.
    ctx = _attn_core(q, k, v, tile_q=tile_q,
                     approx_recip=(cdt != jnp.dtype(jnp.float32)),
                     vmem_cap=vmem_cap)

    # Head merge in XLA.
    ctx2d = jnp.transpose(ctx, (0, 2, 1, 3)).reshape(M, H)

    # 3) output projection + residual + LN2 + MLP + residual (row-tiled).
    out = _proj_ffn(x2d, ctx2d, params, tile_m=tile_m, compute_dtype=cdt,
                    single_buf=single_buf, vmem_cap=vmem_cap)
    return out.reshape(B, S, H)


# ---------------------------------------------------------------------------
# Reference + demo
# ---------------------------------------------------------------------------

def xavier_uniform(key, fan_in, fan_out, dtype=jnp.float32):
    limit = math.sqrt(6.0 / (fan_in + fan_out))
    return jax.random.uniform(key, (fan_in, fan_out), dtype,
                              minval=-limit, maxval=limit)


def reference_block(x, p, num_heads):
    P = jax.lax.Precision.HIGHEST
    B, S, H = x.shape
    hd = H // num_heads

    def ln(v, g, b):
        m = jnp.mean(v, axis=-1, keepdims=True)
        var = jnp.mean(jnp.square(v - m), axis=-1, keepdims=True)
        return (v - m) / jnp.sqrt(var + LN_EPS) * g + b

    xn = ln(x, p["ln1_g"][0], p["ln1_b"][0])
    q = jnp.dot(xn, p["wq"], precision=P) + p["bq"][0]
    k = jnp.dot(xn, p["wk"], precision=P) + p["bk"][0]
    v = jnp.dot(xn, p["wv"], precision=P) + p["bv"][0]

    def split(t):
        return t.reshape(B, S, num_heads, hd).transpose(0, 2, 1, 3)

    qh, kh, vh = split(q), split(k), split(v)
    scores = jnp.einsum("bnqd,bnkd->bnqk", qh, kh, precision=P) / math.sqrt(hd)
    probs = jax.nn.softmax(scores, axis=-1)
    ctx = jnp.einsum("bnqk,bnkd->bnqd", probs, vh, precision=P)
    ctx = ctx.transpose(0, 2, 1, 3).reshape(B, S, H)
    y = jnp.dot(ctx, p["wo"], precision=P) + p["bo"][0] + x

    yn = ln(y, p["ln2_g"][0], p["ln2_b"][0])
    h1 = jnp.dot(yn, p["w1"], precision=P) + p["b1"][0]
    h1 = jax.nn.gelu(h1, approximate=False)
    return jnp.dot(h1, p["w2"], precision=P) + p["b2"][0] + y


if __name__ == "__main__":
    # Small demo config consistent with the module: (batch, seq, hidden).
    batch, seq, hidden, mlp_dim, num_heads = 2, 8, 32, 64, 4

    key = jax.random.PRNGKey(0)
    keys = jax.random.split(key, 13)

    x = jax.random.normal(keys[0], (batch, seq, hidden), jnp.float32)

    def linear(kw, kb, fin, fout, bias_std):
        w = xavier_uniform(kw, fin, fout)                    # stored as (in, out) == W.T
        b = (bias_std * jax.random.normal(kb, (1, fout))).astype(jnp.float32)
        return w, b

    wq, bq = linear(keys[1], keys[2], hidden, hidden, 1e-2)
    wk, bk = linear(keys[3], keys[4], hidden, hidden, 1e-2)
    wv, bv = linear(keys[5], keys[6], hidden, hidden, 1e-2)
    wo, bo = linear(keys[7], keys[8], hidden, hidden, 1e-2)
    w1, b1 = linear(keys[9], keys[10], hidden, mlp_dim, 1e-6)   # Mlp._init_weights
    w2, b2 = linear(keys[11], keys[12], mlp_dim, hidden, 1e-6)

    params = dict(
        ln1_g=jnp.ones((1, hidden), jnp.float32),
        ln1_b=jnp.zeros((1, hidden), jnp.float32),
        ln2_g=jnp.ones((1, hidden), jnp.float32),
        ln2_b=jnp.zeros((1, hidden), jnp.float32),
        wq=wq, bq=bq, wk=wk, bk=bk, wv=wv, bv=bv, wo=wo, bo=bo,
        w1=w1, b1=b1, w2=w2, b2=b2,
    )

    ref = reference_block(x, params, num_heads)

    # Exact-precision mode: f32 matmuls, tight check against the f32 reference.
    out_f32 = jax.block_until_ready(
        block_forward(x, params, num_heads=num_heads, compute_dtype=jnp.float32))
    assert out_f32.shape == x.shape
    err_f32 = float(jnp.max(jnp.abs(out_f32 - ref)))
    assert jnp.allclose(out_f32, ref, atol=1e-4, rtol=1e-4), (
        f"f32 mismatch vs reference, max abs err = {err_f32}")

    # Performance mode: bf16 matmuls on the MXU (looser numerical sanity check).
    out_bf16 = jax.block_until_ready(
        block_forward(x, params, num_heads=num_heads, compute_dtype=jnp.bfloat16))
    assert out_bf16.shape == x.shape
    err_bf16 = float(jnp.max(jnp.abs(out_bf16 - ref)))
    assert jnp.allclose(out_bf16, ref, atol=1.5e-1, rtol=1e-1), (
        f"bf16 mismatch vs reference, max abs err = {err_bf16}")

    print("KERNEL_OK")
</pallas_src>

<mosaic_0001>
module attributes {stable_mosaic.version = 11 : i64} {
  func.func @probe(%arg0: i32, %arg1: memref<8x128xf32, #tpu.memory_space<vmem>>, %arg2: memref<8x128xf32, #tpu.memory_space<vmem>>, %arg3: memref<8x128xf32, #tpu.memory_space<vmem>>) attributes {dimension_semantics = [#tpu.dimension_semantics<arbitrary>], iteration_bounds = array<i64: 1>, scalar_prefetch = 0 : i64, scratch_operands = 0 : i64, tpu.core_type = #tpu.core_type<tc>, window_params = [{pipeline_mode = #tpu.pipeline_mode<synchronous>, transform_indices = @transform_0, window_bounds = array<i64: 8, 128>}, {pipeline_mode = #tpu.pipeline_mode<synchronous>, transform_indices = @transform_1, window_bounds = array<i64: 8, 128>}, {pipeline_mode = #tpu.pipeline_mode<synchronous>, transform_indices = @transform_2, window_bounds = array<i64: 8, 128>}]} {
    %c0 = arith.constant 0 : index
    %c0_0 = arith.constant 0 : index
    %0 = vector.load %arg1[%c0, %c0_0] : memref<8x128xf32, #tpu.memory_space<vmem>>, vector<8x128xf32>
    %c0_1 = arith.constant 0 : index
    %c0_2 = arith.constant 0 : index
    %1 = vector.load %arg2[%c0_1, %c0_2] : memref<8x128xf32, #tpu.memory_space<vmem>>, vector<8x128xf32>
    %2 = arith.addf %0, %1 : vector<8x128xf32>
    %c0_3 = arith.constant 0 : index
    %c0_4 = arith.constant 0 : index
    %3 = vector.load %arg3[%c0_3, %c0_4] : memref<8x128xf32, #tpu.memory_space<vmem>>, vector<8x128xf32>
    tpu.vector_store %arg3[%c0_3, %c0_4], %2 {strides = array<i32>} : memref<8x128xf32, #tpu.memory_space<vmem>>, vector<8x128xf32>,
    return
  }
  func.func @transform_0(%arg0: i32) -> (i32, i32) {
    %c0_i32 = arith.constant 0 : i32
    %c0_i32_0 = arith.constant 0 : i32
    %c0_i32_1 = arith.constant 0 : i32
    return %c0_i32, %c0_i32_0 : i32, i32
  }
  func.func @transform_1(%arg0: i32) -> (i32, i32) {
    %c0_i32 = arith.constant 0 : i32
    %c0_i32_0 = arith.constant 0 : i32
    %c0_i32_1 = arith.constant 0 : i32
    return %c0_i32, %c0_i32_0 : i32, i32
  }
  func.func @transform_2(%arg0: i32) -> (i32, i32) {
    %c0_i32 = arith.constant 0 : i32
    %c0_i32_0 = arith.constant 0 : i32
    %c0_i32_1 = arith.constant 0 : i32
    return %c0_i32, %c0_i32_0 : i32, i32
  }
}

module attributes {stable_mosaic.version = 11 : i64} {
  func.func @_ln_qkv_kernel(%arg0: i32, %arg1: memref<16x32xf32, #tpu.memory_space<vmem>>, %arg2: memref<1x32xf32, #tpu.memory_space<vmem>>, %arg3: memref<1x32xf32, #tpu.memory_space<vmem>>, %arg4: memref<32x96xf32, #tpu.memory_space<vmem>>, %arg5: memref<1x96xf32, #tpu.memory_space<vmem>>, %arg6: memref<16x96xf32, #tpu.memory_space<vmem>>) attributes {dimension_semantics = [#tpu.dimension_semantics<parallel>], iteration_bounds = array<i64: 1>, scalar_prefetch = 0 : i64, scratch_operands = 0 : i64, tpu.core_type = #tpu.core_type<tc>, window_params = [{transform_indices = @transform_0, window_bounds = array<i64: 16, 32>}, {pipeline_mode = #tpu.pipeline_mode<synchronous>, transform_indices = @transform_1, window_bounds = array<i64: 1, 32>}, {pipeline_mode = #tpu.pipeline_mode<synchronous>, transform_indices = @transform_2, window_bounds = array<i64: 1, 32>}, {pipeline_mode = #tpu.pipeline_mode<synchronous>, transform_indices = @transform_3, window_bounds = array<i64: 32, 96>}, {pipeline_mode = #tpu.pipeline_mode<synchronous>, transform_indices = @transform_4, window_bounds = array<i64: 1, 96>}, {transform_indices = @transform_5, window_bounds = array<i64: 16, 96>}]} {
    %c0 = arith.constant 0 : index
    %c0_0 = arith.constant 0 : index
    %0 = vector.load %arg1[%c0, %c0_0] : memref<16x32xf32, #tpu.memory_space<vmem>>, vector<16x32xf32>
    %c0_1 = arith.constant 0 : index
    %c0_2 = arith.constant 0 : index
    %1 = vector.load %arg2[%c0_1, %c0_2] : memref<1x32xf32, #tpu.memory_space<vmem>>, vector<1x32xf32>
    %c0_3 = arith.constant 0 : index
    %c0_4 = arith.constant 0 : index
    %2 = vector.load %arg3[%c0_3, %c0_4] : memref<1x32xf32, #tpu.memory_space<vmem>>, vector<1x32xf32>
    %cst = arith.constant dense<0.000000e+00> : vector<16xf32>
    %3 = vector.multi_reduction <add>, %0, %cst [1] : vector<16x32xf32> to vector<16xf32>
    %4 = vector.shape_cast %3 : vector<16xf32> to vector<16x1xf32>
    %cst_5 = arith.constant 3.200000e+01 : f32
    %5 = vector.broadcast %cst_5 : f32 to vector<16x1xf32>
    %6 = arith.divf %4, %5 : vector<16x1xf32>
    %7 = vector.broadcast %6 : vector<16x1xf32> to vector<16x32xf32>
    %8 = arith.subf %0, %7 : vector<16x32xf32>
    %9 = arith.mulf %8, %8 : vector<16x32xf32>
    %cst_6 = arith.constant dense<0.000000e+00> : vector<16xf32>
    %10 = vector.multi_reduction <add>, %9, %cst_6 [1] : vector<16x32xf32> to vector<16xf32>
    %11 = vector.shape_cast %10 : vector<16xf32> to vector<16x1xf32>
    %cst_7 = arith.constant 3.200000e+01 : f32
    %12 = vector.broadcast %cst_7 : f32 to vector<16x1xf32>
    %13 = arith.divf %11, %12 : vector<16x1xf32>
    %14 = vector.broadcast %6 : vector<16x1xf32> to vector<16x32xf32>
    %15 = arith.subf %0, %14 : vector<16x32xf32>
    %cst_8 = arith.constant 9.99999997E-7 : f32
    %16 = vector.broadcast %cst_8 : f32 to vector<16x1xf32>
    %17 = arith.addf %13, %16 : vector<16x1xf32>
    %18 = math.rsqrt %17 : vector<16x1xf32>
    %19 = vector.broadcast %18 : vector<16x1xf32> to vector<16x32xf32>
    %20 = arith.mulf %15, %19 : vector<16x32xf32>
    %21 = vector.broadcast %1 : vector<1x32xf32> to vector<16x32xf32>
    %22 = arith.mulf %20, %21 : vector<16x32xf32>
    %23 = vector.broadcast %2 : vector<1x32xf32> to vector<16x32xf32>
    %24 = arith.addf %22, %23 : vector<16x32xf32>
    %c0_9 = arith.constant 0 : index
    %c0_10 = arith.constant 0 : index
    %25 = vector.load %arg4[%c0_9, %c0_10] : memref<32x96xf32, #tpu.memory_space<vmem>>, vector<32x96xf32>
    %cst_11 = arith.constant dense<0.000000e+00> : vector<16x96xf32>
    %26 = tpu.matmul %24, %25, %cst_11 {dimension_numbers = #tpu.dot_dimension_numbers<[1], [0], [0], [1], [0, 0, 1, 1], [], []>} : vector<16x32xf32>, vector<32x96xf32>, vector<16x96xf32> -> vector<16x96xf32>
    %c0_12 = arith.constant 0 : index
    %c0_13 = arith.constant 0 : index
    %27 = vector.load %arg5[%c0_12, %c0_13] : memref<1x96xf32, #tpu.memory_space<vmem>>, vector<1x96xf32>
    %28 = vector.broadcast %27 : vector<1x96xf32> to vector<16x96xf32>
    %29 = arith.addf %26, %28 : vector<16x96xf32>
    %c0_14 = arith.constant 0 : index
    %c0_15 = arith.constant 0 : index
    %30 = vector.load %arg6[%c0_14, %c0_15] : memref<16x96xf32, #tpu.memory_space<vmem>>, vector<16x96xf32>
    tpu.vector_store %arg6[%c0_14, %c0_15], %29 {strides = array<i32>} : memref<16x96xf32, #tpu.memory_space<vmem>>, vector<16x96xf32>,
    return
  }
  func.func @transform_0(%arg0: i32) -> (i32, i32) {
    %c0_i32 = arith.constant 0 : i32
    %c0_i32_0 = arith.constant 0 : i32
    return %arg0, %c0_i32 : i32, i32
  }
  func.func @transform_1(%arg0: i32) -> (i32, i32) {
    %c0_i32 = arith.constant 0 : i32
    %c0_i32_0 = arith.constant 0 : i32
    %c0_i32_1 = arith.constant 0 : i32
    return %c0_i32, %c0_i32_0 : i32, i32
  }
  func.func @transform_2(%arg0: i32) -> (i32, i32) {
    %c0_i32 = arith.constant 0 : i32
    %c0_i32_0 = arith.constant 0 : i32
    %c0_i32_1 = arith.constant 0 : i32
    return %c0_i32, %c0_i32_0 : i32, i32
  }
  func.func @transform_3(%arg0: i32) -> (i32, i32) {
    %c0_i32 = arith.constant 0 : i32
    %c0_i32_0 = arith.constant 0 : i32
    %c0_i32_1 = arith.constant 0 : i32
    return %c0_i32, %c0_i32_0 : i32, i32
  }
  func.func @transform_4(%arg0: i32) -> (i32, i32) {
    %c0_i32 = arith.constant 0 : i32
    %c0_i32_0 = arith.constant 0 : i32
    %c0_i32_1 = arith.constant 0 : i32
    return %c0_i32, %c0_i32_0 : i32, i32
  }
  func.func @transform_5(%arg0: i32) -> (i32, i32) {
    %c0_i32 = arith.constant 0 : i32
    %c0_i32_0 = arith.constant 0 : i32
    return %arg0, %c0_i32 : i32, i32
  }
}

</mosaic_0001>

<bundles_post_ra>
// kernel: tpu_custom_call.1
= control target key start
LH: loop header
LB: loop body
LE: loop exit
PB: predicated region body
PF: predicated region fallthrough
CT: control target
= control target key end

     0   :  { %7 = vsyncpa [#allocation3], 0  ;;  %s185_s0 = inlined_call_operand.hbm [shape: f32[8,128], index: 0, kind: input, shape index: {}]   ;;  %s186_s1 = inlined_call_operand.hbm [shape: f32[8,128], index: 1, kind: input, shape index: {}]   ;;  %s187_s2 = inlined_call_operand.hbm [shape: f32[8,128], index: 2, kind: output, shape index: {}]  }
   0x1   :  { %8 = vsyncpa [#allocation6], 0 }
   0x2   :  { %9 = vsyncpa [#allocation4], 0  ;;  %s131_s9 = smov [#allocation2]   ;;  %s132_s11 = smov [#allocation5]  }
   0x3   :  { %s16_s10 = sshll.u32 %s131_s9, 4  ;;  %s26_s12 = sshll.u32 %s132_s11, 4  ;;  %s17_s10 = int_to_ptr.vmem [resolvable:$true] %s16_s10  ;;  %s27_s12 = int_to_ptr.vmem [resolvable:$true] %s26_s12 }
   0x4   :  { %s59_s15 = scalar_lea.hbm %s185_s0, 128 }
   0x5   :  { %p60_p0 = scmp.ne.s32.totalorder %s185_s0, %s59_s15  ;;  %p63_p1 = scmp.lt.u32.totalorder %s59_s15, %s185_s0 }
   0x7   :  { %p65_p2 = pnand %p63_p1, %p60_p0 }
   0x9   :  { %68 = shalt.err (!%p65_p2)
}
   0xa   :  { %s69_s20 = scalar_lea.vmem %s17_s10, 128  ;;  %p74_p4 = scmp.lt.s32.totalorder %s17_s10, %s17_s10 }
   0xb   :  { %p70_p3 = scmp.ne.s32.totalorder %s17_s10, %s69_s20  ;;  %p75_p5 = scmp.lt.s32.totalorder %s69_s20, %s69_s20 }
   0xd   :  { %p76_p6 = por %p75_p5, %p74_p4 }
   0xf   :  { %p77_p7 = pnand %p76_p6, %p70_p3 }
  0x11   :  { %80 = shalt.err (!%p77_p7)
}
  0x12   :  { %19 = dma.hbm_to_vmem [thread:$0]  %s185_s0, 128, %s17_s10, [#allocation3]  }
  0x13   :  { %s81_s25 = scalar_lea.hbm %s186_s1, 128 }
  0x14   :  { %p82_p8 = scmp.ne.s32.totalorder %s186_s1, %s81_s25  ;;  %p85_p9 = scmp.lt.u32.totalorder %s81_s25, %s186_s1 }
  0x16   :  { %p87_p10 = pnand %p85_p9, %p82_p8 }
  0x18   :  { %90 = shalt.err (!%p87_p10)
}
  0x19   :  { %s91_s30 = scalar_lea.vmem %s27_s12, 128  ;;  %p96_p12 = scmp.lt.s32.totalorder %s27_s12, %s27_s12 }
  0x1a   :  { %p92_p11 = scmp.ne.s32.totalorder %s27_s12, %s91_s30  ;;  %p97_p13 = scmp.lt.s32.totalorder %s91_s30, %s91_s30 }
  0x1c   :  { %p98_p0 = por %p97_p13, %p96_p12 }
  0x1e   :  { %p99_p1 = pnand %p98_p0, %p92_p11 }
  0x20   :  { %102 = shalt.err (!%p99_p1)
}
  0x21   :  { %29 = dma.hbm_to_vmem [thread:$0]  %s186_s1, 128, %s27_s12, [#allocation6]  }
  0x22   :  { %125 = dma.done.wait [#allocation3], 128  }
  0x23   :  { %126 = vsyncadd [#allocation3], 4294967168 }
  0x24   :  { %127 = dma.done.wait [#allocation6], 128  }
  0x25   :  { %128 = vsyncadd [#allocation6], 4294967168  ;;  %s133_s4 = smov [#allocation7]   ;;  %v36_v0 = vld [vmem:[#allocation2] sm:$0xff]  ;;  %v37_v1 = vld [vmem:[#allocation5] sm:$0xff] }
  0x26   :  { %s46_s5 = sshll.u32 %s133_s4, 4  ;;  %v38_v2 = vadd.f32 %v37_v1, %v36_v0  ;;  %s47_s5 = int_to_ptr.vmem [resolvable:$true] %s46_s5 }
  0x27   :  { %s103_s6 = scalar_lea.vmem %s47_s5, 128  ;;  %p108_p3 = scmp.lt.s32.totalorder %s47_s5, %s47_s5 }
  0x28   :  { %39 = vst [vmem:[#allocation7] sm:$0xff] %v38_v2  ;;  %p104_p2 = scmp.ne.s32.totalorder %s47_s5, %s103_s6  ;;  %p109_p4 = scmp.lt.s32.totalorder %s103_s6, %s103_s6 }
  0x2a   :  { %p110_p5 = por %p109_p4, %p108_p3 }
  0x2c   :  { %p111_p6 = pnand %p110_p5, %p104_p2 }
  0x2e   :  { %114 = shalt.err (!%p111_p6)
}
  0x2f   :  { %s115_s8 = scalar_lea.hbm %s187_s2, 128 }
  0x30   :  { %p116_p7 = scmp.ne.s32.totalorder %s187_s2, %s115_s8  ;;  %p119_p8 = scmp.lt.u32.totalorder %s115_s8, %s187_s2 }
  0x32   :  { %p121_p9 = pnand %p119_p8, %p116_p7 }
  0x34   :  { %124 = shalt.err (!%p121_p9)
}
  0x35   :  { %49 = dma.vmem_to_hbm [thread:$0]  %s47_s5, 128, %s187_s2, [#allocation4]  }
  0x36   :  { %129 = dma.done.wait [#allocation4], 128  }
  0x37   :  { %130 = vsyncadd [#allocation4], 4294967168 }
  0x38   :  { %53 = vsyncpa [#allocation3], 1 }
  0x39   :  { %54 = vsyncpa [#allocation6], 1 }
  0x3a   :  { %55 = vsyncpa [#allocation4], 1 }

// kernel: tpu_custom_call.1
= control target key start
LH: loop header
LB: loop body
LE: loop exit
PB: predicated region body
PF: predicated region fallthrough
CT: control target
= control target key end

     0   :  { %10 = vsyncpa [#allocation3], 0  ;;  %s416_s0 = inlined_call_operand.hbm [shape: f32[16,32], index: 0, kind: input, shape index: {}]   ;;  %s417_s1 = inlined_call_operand.vmem [shape: f32[1,32], index: 1, kind: input, shape index: {}]   ;;  %s418_s2 = inlined_call_operand.vmem [shape: f32[1,32], index: 2, kind: input, shape index: {}]   ;;  %s419_s3 = inlined_call_operand.hbm [shape: f32[32,96], index: 3, kind: input, shape index: {}]   ;;  %s420_s4 = inlined_call_operand.vmem [shape: f32[1,96], index: 4, kind: input, shape index: {}]   ;;  %s421_s5 = inlined_call_operand.hbm [shape: f32[16,96], index: 5, kind: output, shape index: {}]  }
   0x1   :  { %11 = vsyncpa [#allocation6], 0 }
   0x2   :  { %12 = vsyncpa [#allocation4], 0  ;;  %s321_s18 = smov [#allocation2]   ;;  %s249_s22 = scalar_lea.hbm %s416_s0, 256 }
   0x3   :  { %s18_s19 = sshll.u32 %s321_s18, 4  ;;  %p250_p0 = scmp.ne.s32.totalorder %s416_s0, %s249_s22  ;;  %s19_s19 = int_to_ptr.vmem [resolvable:$true] %s18_s19 }
   0x4   :  { %p253_p1 = scmp.lt.u32.totalorder %s249_s22, %s416_s0 }
   0x6   :  { %p255_p2 = pnand %p253_p1, %p250_p0 }
   0x8   :  { %258 = shalt.err (!%p255_p2)
}
   0x9   :  { %s259_s27 = scalar_lea.vmem %s19_s19, 256  ;;  %p264_p4 = scmp.lt.s32.totalorder %s19_s19, %s19_s19 }
   0xa   :  { %p260_p3 = scmp.ne.s32.totalorder %s19_s19, %s259_s27  ;;  %p265_p5 = scmp.lt.s32.totalorder %s259_s27, %s259_s27 }
   0xc   :  { %p266_p6 = por %p265_p5, %p264_p4 }
   0xe   :  { %p267_p7 = pnand %p266_p6, %p260_p3 }
  0x10   :  { %270 = shalt.err (!%p267_p7)
}
  0x11   :  { %s322_s28 = smov 128   ;;  %s323_s29 = smov 8  }
  0x12   :  { %24 = dma.hbm_to_vmem [thread:$0]  %s416_s0, 256, %s19_s19, [#allocation3], %s322_s28, %s322_s28, %s323_s29  }
  0x13   :  { %s324_s7 = smov [#allocation5]   ;;  %s271_s11 = scalar_lea.hbm %s419_s3, 512 }
  0x14   :  { %s34_s8 = sshll.u32 %s324_s7, 4  ;;  %p272_p8 = scmp.ne.s32.totalorder %s419_s3, %s271_s11  ;;  %s35_s8 = int_to_ptr.vmem [resolvable:$true] %s34_s8 }
  0x15   :  { %p275_p9 = scmp.lt.u32.totalorder %s271_s11, %s419_s3 }
  0x17   :  { %p277_p10 = pnand %p275_p9, %p272_p8 }
  0x19   :  { %280 = shalt.err (!%p277_p10)
}
  0x1a   :  { %s281_s16 = scalar_lea.vmem %s35_s8, 512  ;;  %p286_p12 = scmp.lt.s32.totalorder %s35_s8, %s35_s8 }
  0x1b   :  { %p282_p11 = scmp.ne.s32.totalorder %s35_s8, %s281_s16  ;;  %p287_p13 = scmp.lt.s32.totalorder %s281_s16, %s281_s16 }
  0x1d   :  { %p288_p0 = por %p287_p13, %p286_p12 }
  0x1f   :  { %p289_p1 = pnand %p288_p0, %p282_p11 }
  0x21   :  { %292 = shalt.err (!%p289_p1)
}
  0x22   :  { %40 = dma.hbm_to_vmem [thread:$0]  %s419_s3, 512, %s35_s8, [#allocation6], %s322_s28, %s322_s28, %s323_s29  }
  0x23   :  { %315 = dma.done.wait [#allocation3], 256  }
  0x24   :  { %316 = vsyncadd [#allocation3], 4294967040 }
  0x25   :  { %317 = dma.done.wait [#allocation6], 512  }
  0x26   :  { %318 = vsyncadd [#allocation6], 4294966784  ;;  %vm53_vm0 = vcmask 261120   ;;  %v49_v0 = vld [vmem:[#allocation2] sm:$0xff]  ;;  %v50_v1 = vld [vmem:[#allocation2 + $0x8] sm:$0xff]  ;;  %vm189_vm1 = vcmask 785408  }
  0x27   :  { %v54_v2 = vsel %vm53_vm0, %v49_v0, 0.0  ;;  %v57_v3 = vsel %vm53_vm0, %v50_v1, 0.0  ;;  %v97_v14 = vld [vmem:[#allocation5] sm:$0xff]  ;;  %v98_v15 = vld [vmem:[#allocation5 + $0x8] sm:$0xff]  ;;  %v99_v16 = vld [vmem:[#allocation5 + $0x10] sm:$0xff] }
  0x28   :  { %55 = vadd.xlane.f32.xlu0 %v54_v2  ;;  %v232_v17 = vpack.c.bf16 %v98_v15, %v97_v14  ;;  %v100_v18 = vld [vmem:[#allocation5 + $0x18] sm:$0xff]  ;;  %v210_v27 = vld [vmem:[%s417_s1] ss:$0 sm:$0xff]  ;;  %s325_s1 = smov [#allocation7]  }
  0x29   :  { %v236_v19 = vpack.c.bf16 %v100_v18, %v99_v16  ;;  %v211_v29 = vld [vmem:[%s418_s2] ss:$0 sm:$0xff]  ;;  %s197_s23 = sshll.u32 %s325_s1, 4  ;;  %s198_s23 = int_to_ptr.vmem [resolvable:$true] %s197_s23 }
  0x2a   :  { %233 = vmatprep.subr.bf16.mxu0 %v232_v17  ;;  %v212_v36 = vld [vmem:[%s420_s4] ss:$0 sm:$0xff]  ;;  %s293_s2 = scalar_lea.vmem %s198_s23, 256  ;;  %p298_p3 = scmp.lt.s32.totalorder %s198_s23, %s198_s23 }
  0x2b   :  { %235 = vmatpush3.bf16.msra.mxu0 %v232_v17  ;;  %p294_p2 = scmp.ne.s32.totalorder %s198_s23, %s293_s2  ;;  %p299_p4 = scmp.lt.s32.totalorder %s293_s2, %s293_s2 }
  0x2c   :  { %58 = vadd.xlane.f32.xlu0 %v57_v3  ;;  %237 = vmatprep.subr.bf16.mxu0 %v236_v19 }
  0x2d   :  { %p300_p5 = por %p299_p4, %p298_p3 }
  0x2f   :  { %239 = vmatpush3.bf16.msra.mxu0 %v236_v19  ;;  %p301_p6 = pnand %p300_p5, %p294_p2 }
  0xb5   :  { %v56_v4 = vpop.xlane.xlu0 %55 }
  0xb6   :  { %v61_v5 = vmul.f32 0.03125, %v56_v4 }
  0xb8   :  { %v63_v6 = vsub.f32 %v49_v0, %v61_v5 }
  0xb9   :  { %v59_v7 = vpop.xlane.xlu0 %58 }
  0xba   :  { %v62_v8 = vmul.f32 0.03125, %v59_v7  ;;  %v65_v9 = vmul.f32 %v63_v6, %v63_v6 }
  0xbc   :  { %v64_v10 = vsub.f32 %v50_v1, %v62_v8  ;;  %v67_v11 = vsel %vm53_vm0, %v65_v9, 0.0 }
  0xbd   :  { %68 = vadd.xlane.f32.xlu1 %v67_v11 }
  0xbe   :  { %v66_v12 = vmul.f32 %v64_v10, %v64_v10 }
  0xc0   :  { %v70_v13 = vsel %vm53_vm0, %v66_v12, 0.0 }
  0xc1   :  { %71 = vadd.xlane.f32.xlu1 %v70_v13 }
 0x14a   :  { %v69_v20 = vpop.xlane.xlu1 %68 }
 0x14b   :  { %v73_v21 = vmul.f32 0.03125, %v69_v20 }
 0x14d   :  { %v75_v22 = vadd.f32 1e-06, %v73_v21 }
 0x14e   :  { %v72_v23 = vpop.xlane.xlu1 %71 }
 0x14f   :  { %245 = vrsqrt.f32 %v75_v22  ;;  %v74_v24 = vmul.f32 0.03125, %v72_v23 }
 0x151   :  { %v76_v25 = vadd.f32 1e-06, %v74_v24 }
 0x153   :  { %247 = vrsqrt.f32 %v76_v25 }
 0x159   :  { %v246_v26 = vpop.eup %245 }
 0x15a   :  { %v79_v28 = vmul.f32 %v246_v26, %v63_v6 }
 0x15c   :  { %v87_v30 = vmul.f32 %v210_v27, %v79_v28 }
 0x15d   :  { %v248_v31 = vpop.eup %247 }
 0x15e   :  { %v80_v32 = vmul.f32 %v248_v31, %v64_v10  ;;  %v95_v33 = vadd.f32 %v211_v29, %v87_v30 }
 0x160   :  { %v88_v34 = vmul.f32 %v210_v27, %v80_v32  ;;  %229 = vmatprep.mubr.msk.f32.mxu0 %vm53_vm0, %v95_v33 }
 0x162   :  { %v96_v35 = vadd.f32 %v211_v29, %v88_v34 }
 0x164   :  { %230 = vmatmul.mubr.msk.f32.vlgmr.msra.gmra.mrb[0].mxu0 %vm53_vm0, %v96_v35 }
 0x237   :  { %v231_v37 = vpop.f32.mrb[0].mxu0 }
 0x238   :  { %v186_v38 = vadd.f32 %v231_v37, %v212_v36  ;;  %v180_v39 = vpop.f32.mrb[1].mxu0 }
 0x239   :  { %v181_v40 = vadd.f32 %v212_v36, %v180_v39 }
 0x23a   :  { %191 = vst.msk [vmem:[#allocation7 + $0x8] sm:$0xff] %vm189_vm1, %v186_v38 }
 0x23b   :  { %190 = vst.msk [vmem:[#allocation7] sm:$0xff] %vm189_vm1, %v181_v40 }
 0x23c   :  { %304 = shalt.err (!%p301_p6)
}
 0x23d   :  { %s305_s4 = scalar_lea.hbm %s421_s5, 256 }
 0x23e   :  { %p306_p7 = scmp.ne.s32.totalorder %s421_s5, %s305_s4  ;;  %p309_p8 = scmp.lt.u32.totalorder %s305_s4, %s421_s5 }
 0x240   :  { %p311_p9 = pnand %p309_p8, %p306_p7 }
 0x242   :  { %314 = shalt.err (!%p311_p9)
}
 0x243   :  { %203 = dma.vmem_to_hbm [thread:$0]  %s198_s23, 256, %s421_s5, [#allocation4], %s322_s28, %s322_s28, %s323_s29  }
 0x244   :  { %319 = dma.done.wait [#allocation4], 256  }
 0x245   :  { %320 = vsyncadd [#allocation4], 4294967040 }
 0x246   :  { %207 = vsyncpa [#allocation3], 1 }
 0x247   :  { %208 = vsyncpa [#allocation6], 1 }
 0x248   :  { %209 = vsyncpa [#allocation4], 1 }

</bundles_post_ra>
